<compile_context>
chip_gen: v5e
topology: v5e:2x2
jax: 0.10.0
libtpu: 0.0.40
codegen_flags: <defaults>
</compile_context>

<pallas_src>
import jax
import jax.numpy as jnp
import numpy as np
from jax.experimental import pallas as pl
from jax.experimental.pallas import tpu as pltpu

# ----- module-consistent small hyperparameters -----
INPUT_RES = 16
PATCH = 8
WIDTH = 32
LAYERS = 2
HEADS = 4
BATCH = 2
HEAD_DIM = WIDTH // HEADS
NPATCH = (INPUT_RES // PATCH) ** 2
SEQ = NPATCH + 1                       # +1 class token
PDIM = 3 * PATCH * PATCH               # im2col patch feature size
BF16 = jnp.bfloat16


# --------------- shared math (used inside the Pallas kernel AND the pure-JAX reference) -------
def _mm(a, b):
    # bf16-in / f32-accumulate matmul (native MXU mode).
    return jnp.dot(a.astype(BF16), b.astype(BF16), preferred_element_type=jnp.float32)


def _layer_norm(x, g, b, eps=1e-5):
    x = x.astype(jnp.float32)                       # fp32 LayerNorm subclass semantics
    mu = jnp.mean(x, axis=-1, keepdims=True)
    var = jnp.mean((x - mu) ** 2, axis=-1, keepdims=True)
    return (x - mu) * jax.lax.rsqrt(var + eps) * g + b


def _split_heads(x2d):
    # [S, W] -> [H, S, Dh] via static lane slices + leading-axis stack (no risky reshape).
    return jnp.concatenate(
        [x2d[None, :, h * HEAD_DIM:(h + 1) * HEAD_DIM] for h in range(HEADS)], axis=0)


def _merge_heads(x3d):
    # [H, S, Dh] -> [S, W], head-major columns (matches nn.MultiheadAttention layout).
    return jnp.concatenate([x3d[h] for h in range(HEADS)], axis=1)


def _embed_tokens(patches_b, conv_w_t, pos_cls, ln_pre):
    # conv1-as-matmul patch embedding + [cls | patches] + positional embedding + ln_pre.
    emb = _mm(patches_b, conv_w_t)                                          # [NPATCH, W]
    tok = jnp.concatenate([jnp.zeros((1, WIDTH), jnp.float32), emb], axis=0) + pos_cls
    return _layer_norm(tok, ln_pre[0:1, :], ln_pre[1:2, :])


def _block_math(x, w_qkv_t, b_qkv, w_o_t, w_fc_t, b_fc, w_pr_t, vecs, recip):
    """One ResidualAttentionBlock on a single image; x: [SEQ, WIDTH] f32.

    Matches the module EXACTLY:
        x = ln_1(x)
        x = x + attn(x, x, x)[0]          # residual taken on the NORMALIZED x
        x = x + mlp(ln_2(x))
    """
    ln1_g, ln1_b = vecs[0:1, :], vecs[1:2, :]
    ln2_g, ln2_b = vecs[2:3, :], vecs[3:4, :]
    b_o, b_pr = vecs[4:5, :], vecs[5:6, :]

    x = _layer_norm(x, ln1_g, ln1_b)                                        # x <- ln_1(x)

    qkv = _mm(x, w_qkv_t) + b_qkv                                           # fused QKV matmul
    q = qkv[:, :WIDTH] * (1.0 / float(HEAD_DIM) ** 0.5)
    k = qkv[:, WIDTH:2 * WIDTH]
    v = qkv[:, 2 * WIDTH:]

    qh = _split_heads(q).astype(BF16)                                       # [H, S, Dh]
    kh = _split_heads(k).astype(BF16)
    vh = _split_heads(v).astype(BF16)

    # batched-over-heads scores: [H,S,Dh] x [H,S,Dh] -> [H,S,S]
    s = jax.lax.dot_general(qh, kh, (((2,), (2,)), ((0,), (0,))),
                            preferred_element_type=jnp.float32)
    s = s - jnp.max(s, axis=-1, keepdims=True)
    p = jnp.exp(s)
    p = p * recip(jnp.sum(p, axis=-1, keepdims=True))                       # f32 softmax
    # [H,S,S] x [H,S,Dh] -> [H,S,Dh]
    o = jax.lax.dot_general(p.astype(BF16), vh, (((2,), (1,)), ((0,), (0,))),
                            preferred_element_type=jnp.float32)

    x = x + _mm(_merge_heads(o), w_o_t) + b_o                               # residual on ln_1(x)
    h2 = _layer_norm(x, ln2_g, ln2_b)
    fc = _mm(h2, w_fc_t) + b_fc
    fc = fc * jax.nn.sigmoid(1.702 * fc)                                    # QuickGELU
    return x + _mm(fc, w_pr_t) + b_pr


# --------------------------------- fused Pallas kernel ---------------------------------------
def fused_vit_kernel(patches_ref, convw_ref, poscls_ref, lnpre_ref,
                     wqkv_ref, bqkv_ref, wo_ref, wfc_ref, bfc_ref, wpr_ref, vecs_ref,
                     o_ref):
    layer = pl.program_id(1)

    @pl.when(layer == 0)
    def _():
        # patch embedding + cls/pos + ln_pre, done once per image
        o_ref[...] = _embed_tokens(patches_ref[...], convw_ref[...],
                                   poscls_ref[...], lnpre_ref[...])

    # residual stream carried in the VMEM-resident output block across the layer axis
    o_ref[...] = _block_math(
        o_ref[...], wqkv_ref[...], bqkv_ref[...], wo_ref[...],
        wfc_ref[...], bfc_ref[...], wpr_ref[...], vecs_ref[...],
        recip=lambda t: pl.reciprocal(t, approx=True))


# ------------------------------------- wrappers -----------------------------------------------
def _extract_patches(x):
    """NCHW -> [B, NPATCH, 3*ps*ps] with (c, kh, kw) flatten order (matches conv weight)."""
    # TODO(synk): stride-patch im2col stays as host-side reshape/transpose glue; folding it
    # into the kernel would require in-kernel strided gathers for no measurable gain here.
    B = x.shape[0]
    g = INPUT_RES // PATCH
    p = x.reshape(B, 3, g, PATCH, g, PATCH)
    p = p.transpose(0, 2, 4, 1, 3, 5)
    return p.reshape(B, NPATCH, PDIM)


def forward(x, params):
    """Fused Pallas forward. x: [B, 3, H, W] NCHW f32. Returns [B, SEQ, WIDTH]."""
    B = x.shape[0]
    patches = _extract_patches(x)                             # layout-only host glue
    conv_w_t = params["conv_w"].reshape(WIDTH, PDIM).T        # [PDIM, W]
    pos_cls = params["pos"].at[0].add(params["cls"])          # cls folded into pos row 0

    def lspec(s0, s1):   # stacked per-layer weight, selected by the layer grid index
        return pl.BlockSpec((None, s0, s1), lambda b, l: (l, 0, 0))

    def fspec(s0, s1):   # small whole array, replicated across the grid
        return pl.BlockSpec((s0, s1), lambda b, l: (0, 0))

    return pl.pallas_call(
        fused_vit_kernel,
        out_shape=jax.ShapeDtypeStruct((B, SEQ, WIDTH), jnp.float32),
        grid=(B, LAYERS),
        in_specs=[
            pl.BlockSpec((None, NPATCH, PDIM), lambda b, l: (b, 0, 0)),   # patches
            fspec(PDIM, WIDTH),                                           # conv1 weight (matmul)
            fspec(SEQ, WIDTH),                                            # pos (+cls in row 0)
            fspec(2, WIDTH),                                              # ln_pre gamma/beta
            lspec(WIDTH, 3 * WIDTH),                                      # W_qkv^T  [L, W, 3W]
            lspec(1, 3 * WIDTH),                                          # b_qkv    [L, 1, 3W]
            lspec(WIDTH, WIDTH),                                          # W_out^T  [L, W, W]
            lspec(WIDTH, 4 * WIDTH),                                      # W_fc^T   [L, W, 4W]
            lspec(1, 4 * WIDTH),                                          # b_fc     [L, 1, 4W]
            lspec(4 * WIDTH, WIDTH),                                      # W_proj^T [L, 4W, W]
            lspec(6, WIDTH),                                              # ln1/ln2 g,b + b_out + b_proj
        ],
        out_specs=pl.BlockSpec((None, SEQ, WIDTH), lambda b, l: (b, 0, 0)),
        compiler_params=pltpu.CompilerParams(
            dimension_semantics=("parallel", "arbitrary")),
    )(patches, conv_w_t, pos_cls, params["ln_pre"],
      params["w_qkv_t"], params["b_qkv"], params["w_o_t"],
      params["w_fc_t"], params["b_fc"], params["w_pr_t"], params["vecs"])


# ---------------- pure-JAX reference (identical shared math, no Pallas) -----------------------
def forward_ref(x, params):
    B = x.shape[0]
    patches = _extract_patches(x)
    conv_w_t = params["conv_w"].reshape(WIDTH, PDIM).T
    pos_cls = params["pos"].at[0].add(params["cls"])
    outs = []
    for b in range(B):
        xt = _embed_tokens(patches[b], conv_w_t, pos_cls, params["ln_pre"])
        for l in range(LAYERS):
            xt = _block_math(xt,
                             params["w_qkv_t"][l], params["b_qkv"][l],
                             params["w_o_t"][l], params["w_fc_t"][l],
                             params["b_fc"][l], params["w_pr_t"][l],
                             params["vecs"][l],
                             recip=lambda t: 1.0 / t)
        outs.append(xt)
    return jnp.stack(outs, axis=0)


# ---------------- deterministic parameter init (shapes from __init__), stacked per layer ------
def init_params(key):
    keys = jax.random.split(key, 3 + LAYERS)
    scale = WIDTH ** (-0.5)
    d = WIDTH
    params = {
        "conv_w": 0.02 * jax.random.normal(keys[0], (WIDTH, 3, PATCH, PATCH), jnp.float32),
        "cls": scale * jax.random.normal(keys[1], (WIDTH,), jnp.float32),
        "pos": scale * jax.random.normal(keys[2], (SEQ, WIDTH), jnp.float32),
        "ln_pre": jnp.concatenate([jnp.ones((1, d), jnp.float32),
                                   jnp.zeros((1, d), jnp.float32)], axis=0),
    }
    w_qkv, b_qkv, w_o, w_fc, b_fc, w_pr, vecs = [], [], [], [], [], [], []
    for l in range(LAYERS):
        lk = jax.random.split(keys[3 + l], 8)
        in_proj_w = 0.02 * jax.random.normal(lk[0], (3 * d, d), jnp.float32)   # [3d, d]
        in_proj_b = 0.01 * jax.random.normal(lk[1], (3 * d,), jnp.float32)
        out_w = 0.02 * jax.random.normal(lk[2], (d, d), jnp.float32)
        out_b = 0.01 * jax.random.normal(lk[3], (d,), jnp.float32)
        fc_w = 0.02 * jax.random.normal(lk[4], (4 * d, d), jnp.float32)
        fc_b = 0.01 * jax.random.normal(lk[5], (4 * d,), jnp.float32)
        pr_w = 0.02 * jax.random.normal(lk[6], (d, 4 * d), jnp.float32)
        pr_b = 0.01 * jax.random.normal(lk[7], (d,), jnp.float32)
        w_qkv.append(in_proj_w.T)                     # x @ W_in^T, columns ordered q|k|v
        b_qkv.append(in_proj_b.reshape(1, 3 * d))
        w_o.append(out_w.T)
        w_fc.append(fc_w.T)
        b_fc.append(fc_b.reshape(1, 4 * d))
        w_pr.append(pr_w.T)
        vecs.append(jnp.stack([jnp.ones((d,), jnp.float32), jnp.zeros((d,), jnp.float32),
                               jnp.ones((d,), jnp.float32), jnp.zeros((d,), jnp.float32),
                               out_b, pr_b], axis=0))                      # [6, d]
    params.update(
        w_qkv_t=jnp.stack(w_qkv), b_qkv=jnp.stack(b_qkv), w_o_t=jnp.stack(w_o),
        w_fc_t=jnp.stack(w_fc), b_fc=jnp.stack(b_fc), w_pr_t=jnp.stack(w_pr),
        vecs=jnp.stack(vecs))
    return params


if __name__ == "__main__":
    key = jax.random.PRNGKey(0)
    kx, kp = jax.random.split(key)
    params = init_params(kp)
    x = jax.random.normal(kx, (BATCH, 3, INPUT_RES, INPUT_RES), jnp.float32)

    fwd = jax.jit(forward)
    out = fwd(x, params)
    jax.block_until_ready(out)
    assert out.shape == (BATCH, SEQ, WIDTH)

    ref = forward_ref(x, params)
    np.testing.assert_allclose(np.asarray(out), np.asarray(ref), rtol=1e-3, atol=1e-3)
    print("KERNEL_OK")
</pallas_src>

<mosaic_0001>
module attributes {stable_mosaic.version = 11 : i64} {
  func.func @fused_vit_kernel(%arg0: i32, %arg1: i32, %arg2: memref<1x4x192xf32, #tpu.memory_space<vmem>>, %arg3: memref<192x32xf32, #tpu.memory_space<vmem>>, %arg4: memref<5x32xf32, #tpu.memory_space<vmem>>, %arg5: memref<2x32xf32, #tpu.memory_space<vmem>>, %arg6: memref<1x32x96xf32, #tpu.memory_space<vmem>>, %arg7: memref<1x1x96xf32, #tpu.memory_space<vmem>>, %arg8: memref<1x32x32xf32, #tpu.memory_space<vmem>>, %arg9: memref<1x32x128xf32, #tpu.memory_space<vmem>>, %arg10: memref<1x1x128xf32, #tpu.memory_space<vmem>>, %arg11: memref<1x128x32xf32, #tpu.memory_space<vmem>>, %arg12: memref<1x6x32xf32, #tpu.memory_space<vmem>>, %arg13: memref<1x5x32xf32, #tpu.memory_space<vmem>>) attributes {dimension_semantics = [#tpu.dimension_semantics<parallel>, #tpu.dimension_semantics<arbitrary>], iteration_bounds = array<i64: 2, 2>, scalar_prefetch = 0 : i64, scratch_operands = 0 : i64, tpu.core_type = #tpu.core_type<tc>, window_params = [{transform_indices = @transform_0, window_bounds = array<i64: 1, 4, 192>}, {pipeline_mode = #tpu.pipeline_mode<synchronous>, transform_indices = @transform_1, window_bounds = array<i64: 192, 32>}, {pipeline_mode = #tpu.pipeline_mode<synchronous>, transform_indices = @transform_2, window_bounds = array<i64: 5, 32>}, {pipeline_mode = #tpu.pipeline_mode<synchronous>, transform_indices = @transform_3, window_bounds = array<i64: 2, 32>}, {transform_indices = @transform_4, window_bounds = array<i64: 1, 32, 96>}, {transform_indices = @transform_5, window_bounds = array<i64: 1, 1, 96>}, {transform_indices = @transform_6, window_bounds = array<i64: 1, 32, 32>}, {transform_indices = @transform_7, window_bounds = array<i64: 1, 32, 128>}, {transform_indices = @transform_8, window_bounds = array<i64: 1, 1, 128>}, {transform_indices = @transform_9, window_bounds = array<i64: 1, 128, 32>}, {transform_indices = @transform_10, window_bounds = array<i64: 1, 6, 32>}, {transform_indices = @transform_11, window_bounds = array<i64: 1, 5, 32>}]} {
    %c0_i32 = arith.constant 0 : i32
    %0 = arith.cmpi eq, %arg1, %c0_i32 : i32
    %1 = arith.extui %0 : i1 to i32
    %c0_i32_0 = arith.constant 0 : i32
    %2 = arith.cmpi ne, %1, %c0_i32_0 : i32
    scf.if %2 {
      %c0_47 = arith.constant 0 : index
      %c0_48 = arith.constant 0 : index
      %c0_49 = arith.constant 0 : index
      %159 = vector.load %arg2[%c0_47, %c0_48, %c0_49] : memref<1x4x192xf32, #tpu.memory_space<vmem>>, vector<1x4x192xf32>
      %160 = vector.shape_cast %159 : vector<1x4x192xf32> to vector<4x192xf32>
      %c0_50 = arith.constant 0 : index
      %c0_51 = arith.constant 0 : index
      %161 = vector.load %arg3[%c0_50, %c0_51] : memref<192x32xf32, #tpu.memory_space<vmem>>, vector<192x32xf32>
      %c0_52 = arith.constant 0 : index
      %c0_53 = arith.constant 0 : index
      %162 = vector.load %arg4[%c0_52, %c0_53] : memref<5x32xf32, #tpu.memory_space<vmem>>, vector<5x32xf32>
      %c0_54 = arith.constant 0 : index
      %c0_55 = arith.constant 0 : index
      %163 = vector.load %arg5[%c0_54, %c0_55] : memref<2x32xf32, #tpu.memory_space<vmem>>, vector<2x32xf32>
      %164 = arith.truncf %160 : vector<4x192xf32> to vector<4x192xbf16>
      %165 = arith.truncf %161 : vector<192x32xf32> to vector<192x32xbf16>
      %cst_56 = arith.constant dense<0.000000e+00> : vector<4x32xf32>
      %166 = tpu.matmul %164, %165, %cst_56 {dimension_numbers = #tpu.dot_dimension_numbers<[1], [0], [0], [1], [0, 0, 1, 1], [], []>} : vector<4x192xbf16>, vector<192x32xbf16>, vector<4x32xf32> -> vector<4x32xf32>
      %cst_57 = arith.constant 0.000000e+00 : f32
      %167 = vector.broadcast %cst_57 : f32 to vector<1x32xf32>
      %168 = tpu.concatenate %167, %166 in 0 : vector<1x32xf32>, vector<4x32xf32> -> vector<5x32xf32>
      %169 = arith.addf %168, %162 : vector<5x32xf32>
      %170 = vector.extract_strided_slice %163 {offsets = [0, 0], sizes = [1, 32], strides = [1, 1]} : vector<2x32xf32> to vector<1x32xf32>
      %171 = vector.extract_strided_slice %163 {offsets = [1, 0], sizes = [1, 32], strides = [1, 1]} : vector<2x32xf32> to vector<1x32xf32>
      %cst_58 = arith.constant dense<0.000000e+00> : vector<5xf32>
      %172 = vector.multi_reduction <add>, %169, %cst_58 [1] : vector<5x32xf32> to vector<5xf32>
      %173 = vector.shape_cast %172 : vector<5xf32> to vector<5x1xf32>
      %cst_59 = arith.constant 3.200000e+01 : f32
      %174 = vector.broadcast %cst_59 : f32 to vector<5x1xf32>
      %175 = arith.divf %173, %174 : vector<5x1xf32>
      %176 = vector.broadcast %175 : vector<5x1xf32> to vector<5x32xf32>
      %177 = arith.subf %169, %176 : vector<5x32xf32>
      %178 = arith.mulf %177, %177 : vector<5x32xf32>
      %cst_60 = arith.constant dense<0.000000e+00> : vector<5xf32>
      %179 = vector.multi_reduction <add>, %178, %cst_60 [1] : vector<5x32xf32> to vector<5xf32>
      %180 = vector.shape_cast %179 : vector<5xf32> to vector<5x1xf32>
      %cst_61 = arith.constant 3.200000e+01 : f32
      %181 = vector.broadcast %cst_61 : f32 to vector<5x1xf32>
      %182 = arith.divf %180, %181 : vector<5x1xf32>
      %183 = vector.broadcast %175 : vector<5x1xf32> to vector<5x32xf32>
      %184 = arith.subf %169, %183 : vector<5x32xf32>
      %cst_62 = arith.constant 9.99999974E-6 : f32
      %185 = vector.broadcast %cst_62 : f32 to vector<5x1xf32>
      %186 = arith.addf %182, %185 : vector<5x1xf32>
      %187 = math.rsqrt %186 : vector<5x1xf32>
      %188 = vector.broadcast %187 : vector<5x1xf32> to vector<5x32xf32>
      %189 = arith.mulf %184, %188 : vector<5x32xf32>
      %190 = vector.broadcast %170 : vector<1x32xf32> to vector<5x32xf32>
      %191 = arith.mulf %189, %190 : vector<5x32xf32>
      %192 = vector.broadcast %171 : vector<1x32xf32> to vector<5x32xf32>
      %193 = arith.addf %191, %192 : vector<5x32xf32>
      %c0_63 = arith.constant 0 : index
      %c0_64 = arith.constant 0 : index
      %c0_65 = arith.constant 0 : index
      %194 = vector.load %arg13[%c0_63, %c0_64, %c0_65] : memref<1x5x32xf32, #tpu.memory_space<vmem>>, vector<1x5x32xf32>
      %195 = vector.shape_cast %194 : vector<1x5x32xf32> to vector<5x32xf32>
      %196 = vector.shape_cast %193 : vector<5x32xf32> to vector<1x5x32xf32>
      tpu.vector_store %arg13[%c0_63, %c0_64, %c0_65], %196 {strides = array<i32>} : memref<1x5x32xf32, #tpu.memory_space<vmem>>, vector<1x5x32xf32>,
    } else {
    }
    %c0 = arith.constant 0 : index
    %c0_1 = arith.constant 0 : index
    %c0_2 = arith.constant 0 : index
    %3 = vector.load %arg13[%c0, %c0_1, %c0_2] : memref<1x5x32xf32, #tpu.memory_space<vmem>>, vector<1x5x32xf32>
    %4 = vector.shape_cast %3 : vector<1x5x32xf32> to vector<5x32xf32>
    %c0_3 = arith.constant 0 : index
    %c0_4 = arith.constant 0 : index
    %c0_5 = arith.constant 0 : index
    %5 = vector.load %arg6[%c0_3, %c0_4, %c0_5] : memref<1x32x96xf32, #tpu.memory_space<vmem>>, vector<1x32x96xf32>
    %6 = vector.shape_cast %5 : vector<1x32x96xf32> to vector<32x96xf32>
    %c0_6 = arith.constant 0 : index
    %c0_7 = arith.constant 0 : index
    %c0_8 = arith.constant 0 : index
    %7 = vector.load %arg7[%c0_6, %c0_7, %c0_8] : memref<1x1x96xf32, #tpu.memory_space<vmem>>, vector<1x1x96xf32>
    %8 = vector.shape_cast %7 : vector<1x1x96xf32> to vector<1x96xf32>
    %c0_9 = arith.constant 0 : index
    %c0_10 = arith.constant 0 : index
    %c0_11 = arith.constant 0 : index
    %9 = vector.load %arg8[%c0_9, %c0_10, %c0_11] : memref<1x32x32xf32, #tpu.memory_space<vmem>>, vector<1x32x32xf32>
    %10 = vector.shape_cast %9 : vector<1x32x32xf32> to vector<32x32xf32>
    %c0_12 = arith.constant 0 : index
    %c0_13 = arith.constant 0 : index
    %c0_14 = arith.constant 0 : index
    %11 = vector.load %arg9[%c0_12, %c0_13, %c0_14] : memref<1x32x128xf32, #tpu.memory_space<vmem>>, vector<1x32x128xf32>
    %12 = vector.shape_cast %11 : vector<1x32x128xf32> to vector<32x128xf32>
    %c0_15 = arith.constant 0 : index
    %c0_16 = arith.constant 0 : index
    %c0_17 = arith.constant 0 : index
    %13 = vector.load %arg10[%c0_15, %c0_16, %c0_17] : memref<1x1x128xf32, #tpu.memory_space<vmem>>, vector<1x1x128xf32>
    %14 = vector.shape_cast %13 : vector<1x1x128xf32> to vector<1x128xf32>
    %c0_18 = arith.constant 0 : index
    %c0_19 = arith.constant 0 : index
    %c0_20 = arith.constant 0 : index
    %15 = vector.load %arg11[%c0_18, %c0_19, %c0_20] : memref<1x128x32xf32, #tpu.memory_space<vmem>>, vector<1x128x32xf32>
    %16 = vector.shape_cast %15 : vector<1x128x32xf32> to vector<128x32xf32>
    %c0_21 = arith.constant 0 : index
    %c0_22 = arith.constant 0 : index
    %c0_23 = arith.constant 0 : index
    %17 = vector.load %arg12[%c0_21, %c0_22, %c0_23] : memref<1x6x32xf32, #tpu.memory_space<vmem>>, vector<1x6x32xf32>
    %18 = vector.shape_cast %17 : vector<1x6x32xf32> to vector<6x32xf32>
    %19 = vector.extract_strided_slice %18 {offsets = [0, 0], sizes = [1, 32], strides = [1, 1]} : vector<6x32xf32> to vector<1x32xf32>
    %20 = vector.extract_strided_slice %18 {offsets = [1, 0], sizes = [1, 32], strides = [1, 1]} : vector<6x32xf32> to vector<1x32xf32>
    %21 = vector.extract_strided_slice %18 {offsets = [2, 0], sizes = [1, 32], strides = [1, 1]} : vector<6x32xf32> to vector<1x32xf32>
    %22 = vector.extract_strided_slice %18 {offsets = [3, 0], sizes = [1, 32], strides = [1, 1]} : vector<6x32xf32> to vector<1x32xf32>
    %23 = vector.extract_strided_slice %18 {offsets = [4, 0], sizes = [1, 32], strides = [1, 1]} : vector<6x32xf32> to vector<1x32xf32>
    %24 = vector.extract_strided_slice %18 {offsets = [5, 0], sizes = [1, 32], strides = [1, 1]} : vector<6x32xf32> to vector<1x32xf32>
    %cst = arith.constant dense<0.000000e+00> : vector<5xf32>
    %25 = vector.multi_reduction <add>, %4, %cst [1] : vector<5x32xf32> to vector<5xf32>
    %26 = vector.shape_cast %25 : vector<5xf32> to vector<5x1xf32>
    %cst_24 = arith.constant 3.200000e+01 : f32
    %27 = vector.broadcast %cst_24 : f32 to vector<5x1xf32>
    %28 = arith.divf %26, %27 : vector<5x1xf32>
    %29 = vector.broadcast %28 : vector<5x1xf32> to vector<5x32xf32>
    %30 = arith.subf %4, %29 : vector<5x32xf32>
    %31 = arith.mulf %30, %30 : vector<5x32xf32>
    %cst_25 = arith.constant dense<0.000000e+00> : vector<5xf32>
    %32 = vector.multi_reduction <add>, %31, %cst_25 [1] : vector<5x32xf32> to vector<5xf32>
    %33 = vector.shape_cast %32 : vector<5xf32> to vector<5x1xf32>
    %cst_26 = arith.constant 3.200000e+01 : f32
    %34 = vector.broadcast %cst_26 : f32 to vector<5x1xf32>
    %35 = arith.divf %33, %34 : vector<5x1xf32>
    %36 = vector.broadcast %28 : vector<5x1xf32> to vector<5x32xf32>
    %37 = arith.subf %4, %36 : vector<5x32xf32>
    %cst_27 = arith.constant 9.99999974E-6 : f32
    %38 = vector.broadcast %cst_27 : f32 to vector<5x1xf32>
    %39 = arith.addf %35, %38 : vector<5x1xf32>
    %40 = math.rsqrt %39 : vector<5x1xf32>
    %41 = vector.broadcast %40 : vector<5x1xf32> to vector<5x32xf32>
    %42 = arith.mulf %37, %41 : vector<5x32xf32>
    %43 = vector.broadcast %19 : vector<1x32xf32> to vector<5x32xf32>
    %44 = arith.mulf %42, %43 : vector<5x32xf32>
    %45 = vector.broadcast %20 : vector<1x32xf32> to vector<5x32xf32>
    %46 = arith.addf %44, %45 : vector<5x32xf32>
    %47 = arith.truncf %46 : vector<5x32xf32> to vector<5x32xbf16>
    %48 = arith.truncf %6 : vector<32x96xf32> to vector<32x96xbf16>
    %cst_28 = arith.constant dense<0.000000e+00> : vector<5x96xf32>
    %49 = tpu.matmul %47, %48, %cst_28 {dimension_numbers = #tpu.dot_dimension_numbers<[1], [0], [0], [1], [0, 0, 1, 1], [], []>} : vector<5x32xbf16>, vector<32x96xbf16>, vector<5x96xf32> -> vector<5x96xf32>
    %50 = vector.broadcast %8 : vector<1x96xf32> to vector<5x96xf32>
    %51 = arith.addf %49, %50 : vector<5x96xf32>
    %52 = vector.extract_strided_slice %51 {offsets = [0, 0], sizes = [5, 32], strides = [1, 1]} : vector<5x96xf32> to vector<5x32xf32>
    %cst_29 = arith.constant 0.353553385 : f32
    %53 = vector.broadcast %cst_29 : f32 to vector<5x32xf32>
    %54 = arith.mulf %52, %53 : vector<5x32xf32>
    %55 = vector.extract_strided_slice %51 {offsets = [0, 32], sizes = [5, 32], strides = [1, 1]} : vector<5x96xf32> to vector<5x32xf32>
    %56 = vector.extract_strided_slice %51 {offsets = [0, 64], sizes = [5, 32], strides = [1, 1]} : vector<5x96xf32> to vector<5x32xf32>
    %57 = vector.extract_strided_slice %54 {offsets = [0, 0], sizes = [5, 8], strides = [1, 1]} : vector<5x32xf32> to vector<5x8xf32>
    %58 = vector.shape_cast %57 : vector<5x8xf32> to vector<1x5x8xf32>
    %59 = vector.extract_strided_slice %54 {offsets = [0, 8], sizes = [5, 8], strides = [1, 1]} : vector<5x32xf32> to vector<5x8xf32>
    %60 = vector.shape_cast %59 : vector<5x8xf32> to vector<1x5x8xf32>
    %61 = vector.extract_strided_slice %54 {offsets = [0, 16], sizes = [5, 8], strides = [1, 1]} : vector<5x32xf32> to vector<5x8xf32>
    %62 = vector.shape_cast %61 : vector<5x8xf32> to vector<1x5x8xf32>
    %63 = vector.extract_strided_slice %54 {offsets = [0, 24], sizes = [5, 8], strides = [1, 1]} : vector<5x32xf32> to vector<5x8xf32>
    %64 = vector.shape_cast %63 : vector<5x8xf32> to vector<1x5x8xf32>
    %65 = tpu.concatenate %58, %60, %62, %64 in 0 : vector<1x5x8xf32>, vector<1x5x8xf32>, vector<1x5x8xf32>, vector<1x5x8xf32> -> vector<4x5x8xf32>
    %66 = arith.truncf %65 : vector<4x5x8xf32> to vector<4x5x8xbf16>
    %67 = vector.extract_strided_slice %55 {offsets = [0, 0], sizes = [5, 8], strides = [1, 1]} : vector<5x32xf32> to vector<5x8xf32>
    %68 = vector.shape_cast %67 : vector<5x8xf32> to vector<1x5x8xf32>
    %69 = vector.extract_strided_slice %55 {offsets = [0, 8], sizes = [5, 8], strides = [1, 1]} : vector<5x32xf32> to vector<5x8xf32>
    %70 = vector.shape_cast %69 : vector<5x8xf32> to vector<1x5x8xf32>
    %71 = vector.extract_strided_slice %55 {offsets = [0, 16], sizes = [5, 8], strides = [1, 1]} : vector<5x32xf32> to vector<5x8xf32>
    %72 = vector.shape_cast %71 : vector<5x8xf32> to vector<1x5x8xf32>
    %73 = vector.extract_strided_slice %55 {offsets = [0, 24], sizes = [5, 8], strides = [1, 1]} : vector<5x32xf32> to vector<5x8xf32>
    %74 = vector.shape_cast %73 : vector<5x8xf32> to vector<1x5x8xf32>
    %75 = tpu.concatenate %68, %70, %72, %74 in 0 : vector<1x5x8xf32>, vector<1x5x8xf32>, vector<1x5x8xf32>, vector<1x5x8xf32> -> vector<4x5x8xf32>
    %76 = arith.truncf %75 : vector<4x5x8xf32> to vector<4x5x8xbf16>
    %77 = vector.extract_strided_slice %56 {offsets = [0, 0], sizes = [5, 8], strides = [1, 1]} : vector<5x32xf32> to vector<5x8xf32>
    %78 = vector.shape_cast %77 : vector<5x8xf32> to vector<1x5x8xf32>
    %79 = vector.extract_strided_slice %56 {offsets = [0, 8], sizes = [5, 8], strides = [1, 1]} : vector<5x32xf32> to vector<5x8xf32>
    %80 = vector.shape_cast %79 : vector<5x8xf32> to vector<1x5x8xf32>
    %81 = vector.extract_strided_slice %56 {offsets = [0, 16], sizes = [5, 8], strides = [1, 1]} : vector<5x32xf32> to vector<5x8xf32>
    %82 = vector.shape_cast %81 : vector<5x8xf32> to vector<1x5x8xf32>
    %83 = vector.extract_strided_slice %56 {offsets = [0, 24], sizes = [5, 8], strides = [1, 1]} : vector<5x32xf32> to vector<5x8xf32>
    %84 = vector.shape_cast %83 : vector<5x8xf32> to vector<1x5x8xf32>
    %85 = tpu.concatenate %78, %80, %82, %84 in 0 : vector<1x5x8xf32>, vector<1x5x8xf32>, vector<1x5x8xf32>, vector<1x5x8xf32> -> vector<4x5x8xf32>
    %86 = arith.truncf %85 : vector<4x5x8xf32> to vector<4x5x8xbf16>
    %cst_30 = arith.constant dense<0.000000e+00> : vector<4x5x5xf32>
    %87 = tpu.matmul %66, %76, %cst_30 {dimension_numbers = #tpu.dot_dimension_numbers<[2], [2], [1], [1], [0, 0, 0, 1, 1, 1], [0], [0]>} : vector<4x5x8xbf16>, vector<4x5x8xbf16>, vector<4x5x5xf32> -> vector<4x5x5xf32>
    %cst_31 = arith.constant dense<0xFF800000> : vector<4x5xf32>
    %88 = vector.multi_reduction <maximumf>, %87, %cst_31 [2] : vector<4x5x5xf32> to vector<4x5xf32>
    %89 = vector.shape_cast %88 : vector<4x5xf32> to vector<4x5x1xf32>
    %90 = vector.broadcast %89 : vector<4x5x1xf32> to vector<4x5x5xf32>
    %91 = arith.subf %87, %90 : vector<4x5x5xf32>
    %92 = math.exp %91 : vector<4x5x5xf32>
    %cst_32 = arith.constant dense<0.000000e+00> : vector<4x5xf32>
    %93 = vector.multi_reduction <add>, %92, %cst_32 [2] : vector<4x5x5xf32> to vector<4x5xf32>
    %94 = vector.shape_cast %93 : vector<4x5xf32> to vector<4x5x1xf32>
    %95 = tpu.reciprocal %94 {approx = true} : vector<4x5x1xf32> -> vector<4x5x1xf32>
    %96 = vector.broadcast %95 : vector<4x5x1xf32> to vector<4x5x5xf32>
    %97 = arith.mulf %92, %96 : vector<4x5x5xf32>
    %98 = arith.truncf %97 : vector<4x5x5xf32> to vector<4x5x5xbf16>
    %cst_33 = arith.constant dense<0.000000e+00> : vector<4x5x8xf32>
    %99 = tpu.matmul %98, %86, %cst_33 {dimension_numbers = #tpu.dot_dimension_numbers<[2], [1], [1], [2], [0, 0, 0, 1, 1, 2], [0], [0]>} : vector<4x5x5xbf16>, vector<4x5x8xbf16>, vector<4x5x8xf32> -> vector<4x5x8xf32>
    %100 = vector.extract_strided_slice %99 {offsets = [0, 0, 0], sizes = [1, 5, 8], strides = [1, 1, 1]} : vector<4x5x8xf32> to vector<1x5x8xf32>
    %101 = vector.shape_cast %100 : vector<1x5x8xf32> to vector<5x8xf32>
    %102 = vector.extract_strided_slice %99 {offsets = [1, 0, 0], sizes = [1, 5, 8], strides = [1, 1, 1]} : vector<4x5x8xf32> to vector<1x5x8xf32>
    %103 = vector.shape_cast %102 : vector<1x5x8xf32> to vector<5x8xf32>
    %104 = vector.extract_strided_slice %99 {offsets = [2, 0, 0], sizes = [1, 5, 8], strides = [1, 1, 1]} : vector<4x5x8xf32> to vector<1x5x8xf32>
    %105 = vector.shape_cast %104 : vector<1x5x8xf32> to vector<5x8xf32>
    %106 = vector.extract_strided_slice %99 {offsets = [3, 0, 0], sizes = [1, 5, 8], strides = [1, 1, 1]} : vector<4x5x8xf32> to vector<1x5x8xf32>
    %107 = vector.shape_cast %106 : vector<1x5x8xf32> to vector<5x8xf32>
    %108 = tpu.concatenate %101, %103, %105, %107 in 1 : vector<5x8xf32>, vector<5x8xf32>, vector<5x8xf32>, vector<5x8xf32> -> vector<5x32xf32>
    %109 = arith.truncf %108 : vector<5x32xf32> to vector<5x32xbf16>
    %110 = arith.truncf %10 : vector<32x32xf32> to vector<32x32xbf16>
    %cst_34 = arith.constant dense<0.000000e+00> : vector<5x32xf32>
    %111 = tpu.matmul %109, %110, %cst_34 {dimension_numbers = #tpu.dot_dimension_numbers<[1], [0], [0], [1], [0, 0, 1, 1], [], []>} : vector<5x32xbf16>, vector<32x32xbf16>, vector<5x32xf32> -> vector<5x32xf32>
    %112 = arith.addf %46, %111 : vector<5x32xf32>
    %113 = vector.broadcast %23 : vector<1x32xf32> to vector<5x32xf32>
    %114 = arith.addf %112, %113 : vector<5x32xf32>
    %cst_35 = arith.constant dense<0.000000e+00> : vector<5xf32>
    %115 = vector.multi_reduction <add>, %114, %cst_35 [1] : vector<5x32xf32> to vector<5xf32>
    %116 = vector.shape_cast %115 : vector<5xf32> to vector<5x1xf32>
    %cst_36 = arith.constant 3.200000e+01 : f32
    %117 = vector.broadcast %cst_36 : f32 to vector<5x1xf32>
    %118 = arith.divf %116, %117 : vector<5x1xf32>
    %119 = vector.broadcast %118 : vector<5x1xf32> to vector<5x32xf32>
    %120 = arith.subf %114, %119 : vector<5x32xf32>
    %121 = arith.mulf %120, %120 : vector<5x32xf32>
    %cst_37 = arith.constant dense<0.000000e+00> : vector<5xf32>
    %122 = vector.multi_reduction <add>, %121, %cst_37 [1] : vector<5x32xf32> to vector<5xf32>
    %123 = vector.shape_cast %122 : vector<5xf32> to vector<5x1xf32>
    %cst_38 = arith.constant 3.200000e+01 : f32
    %124 = vector.broadcast %cst_38 : f32 to vector<5x1xf32>
    %125 = arith.divf %123, %124 : vector<5x1xf32>
    %126 = vector.broadcast %118 : vector<5x1xf32> to vector<5x32xf32>
    %127 = arith.subf %114, %126 : vector<5x32xf32>
    %cst_39 = arith.constant 9.99999974E-6 : f32
    %128 = vector.broadcast %cst_39 : f32 to vector<5x1xf32>
    %129 = arith.addf %125, %128 : vector<5x1xf32>
    %130 = math.rsqrt %129 : vector<5x1xf32>
    %131 = vector.broadcast %130 : vector<5x1xf32> to vector<5x32xf32>
    %132 = arith.mulf %127, %131 : vector<5x32xf32>
    %133 = vector.broadcast %21 : vector<1x32xf32> to vector<5x32xf32>
    %134 = arith.mulf %132, %133 : vector<5x32xf32>
    %135 = vector.broadcast %22 : vector<1x32xf32> to vector<5x32xf32>
    %136 = arith.addf %134, %135 : vector<5x32xf32>
    %137 = arith.truncf %136 : vector<5x32xf32> to vector<5x32xbf16>
    %138 = arith.truncf %12 : vector<32x128xf32> to vector<32x128xbf16>
    %cst_40 = arith.constant dense<0.000000e+00> : vector<5x128xf32>
    %139 = tpu.matmul %137, %138, %cst_40 {dimension_numbers = #tpu.dot_dimension_numbers<[1], [0], [0], [1], [0, 0, 1, 1], [], []>} : vector<5x32xbf16>, vector<32x128xbf16>, vector<5x128xf32> -> vector<5x128xf32>
    %140 = vector.broadcast %14 : vector<1x128xf32> to vector<5x128xf32>
    %141 = arith.addf %139, %140 : vector<5x128xf32>
    %cst_41 = arith.constant 1.702000e+00 : f32
    %142 = vector.broadcast %cst_41 : f32 to vector<5x128xf32>
    %143 = arith.mulf %142, %141 : vector<5x128xf32>
    %144 = arith.negf %143 : vector<5x128xf32>
    %145 = math.exp %144 : vector<5x128xf32>
    %cst_42 = arith.constant 1.000000e+00 : f32
    %146 = vector.broadcast %cst_42 : f32 to vector<5x128xf32>
    %147 = arith.addf %146, %145 : vector<5x128xf32>
    %148 = arith.divf %146, %147 : vector<5x128xf32>
    %149 = arith.mulf %141, %148 : vector<5x128xf32>
    %150 = arith.truncf %149 : vector<5x128xf32> to vector<5x128xbf16>
    %151 = arith.truncf %16 : vector<128x32xf32> to vector<128x32xbf16>
    %cst_43 = arith.constant dense<0.000000e+00> : vector<5x32xf32>
    %152 = tpu.matmul %150, %151, %cst_43 {dimension_numbers = #tpu.dot_dimension_numbers<[1], [0], [0], [1], [0, 0, 1, 1], [], []>} : vector<5x128xbf16>, vector<128x32xbf16>, vector<5x32xf32> -> vector<5x32xf32>
    %153 = arith.addf %114, %152 : vector<5x32xf32>
    %154 = vector.broadcast %24 : vector<1x32xf32> to vector<5x32xf32>
    %155 = arith.addf %153, %154 : vector<5x32xf32>
    %c0_44 = arith.constant 0 : index
    %c0_45 = arith.constant 0 : index
    %c0_46 = arith.constant 0 : index
    %156 = vector.load %arg13[%c0_44, %c0_45, %c0_46] : memref<1x5x32xf32, #tpu.memory_space<vmem>>, vector<1x5x32xf32>
    %157 = vector.shape_cast %156 : vector<1x5x32xf32> to vector<5x32xf32>
    %158 = vector.shape_cast %155 : vector<5x32xf32> to vector<1x5x32xf32>
    tpu.vector_store %arg13[%c0_44, %c0_45, %c0_46], %158 {strides = array<i32>} : memref<1x5x32xf32, #tpu.memory_space<vmem>>, vector<1x5x32xf32>,
    return
  }
  func.func @transform_0(%arg0: i32, %arg1: i32) -> (i32, i32, i32) {
    %c0_i32 = arith.constant 0 : i32
    %c0_i32_0 = arith.constant 0 : i32
    %c0_i32_1 = arith.constant 0 : i32
    return %arg0, %c0_i32, %c0_i32_0 : i32, i32, i32
  }
  func.func @transform_1(%arg0: i32, %arg1: i32) -> (i32, i32) {
    %c0_i32 = arith.constant 0 : i32
    %c0_i32_0 = arith.constant 0 : i32
    %c0_i32_1 = arith.constant 0 : i32
    return %c0_i32, %c0_i32_0 : i32, i32
  }
  func.func @transform_2(%arg0: i32, %arg1: i32) -> (i32, i32) {
    %c0_i32 = arith.constant 0 : i32
    %c0_i32_0 = arith.constant 0 : i32
    %c0_i32_1 = arith.constant 0 : i32
    return %c0_i32, %c0_i32_0 : i32, i32
  }
  func.func @transform_3(%arg0: i32, %arg1: i32) -> (i32, i32) {
    %c0_i32 = arith.constant 0 : i32
    %c0_i32_0 = arith.constant 0 : i32
    %c0_i32_1 = arith.constant 0 : i32
    return %c0_i32, %c0_i32_0 : i32, i32
  }
  func.func @transform_4(%arg0: i32, %arg1: i32) -> (i32, i32, i32) {
    %c0_i32 = arith.constant 0 : i32
    %c0_i32_0 = arith.constant 0 : i32
    %c0_i32_1 = arith.constant 0 : i32
    return %arg1, %c0_i32, %c0_i32_0 : i32, i32, i32
  }
  func.func @transform_5(%arg0: i32, %arg1: i32) -> (i32, i32, i32) {
    %c0_i32 = arith.constant 0 : i32
    %c0_i32_0 = arith.constant 0 : i32
    %c0_i32_1 = arith.constant 0 : i32
    return %arg1, %c0_i32, %c0_i32_0 : i32, i32, i32
  }
  func.func @transform_6(%arg0: i32, %arg1: i32) -> (i32, i32, i32) {
    %c0_i32 = arith.constant 0 : i32
    %c0_i32_0 = arith.constant 0 : i32
    %c0_i32_1 = arith.constant 0 : i32
    return %arg1, %c0_i32, %c0_i32_0 : i32, i32, i32
  }
  func.func @transform_7(%arg0: i32, %arg1: i32) -> (i32, i32, i32) {
    %c0_i32 = arith.constant 0 : i32
    %c0_i32_0 = arith.constant 0 : i32
    %c0_i32_1 = arith.constant 0 : i32
    return %arg1, %c0_i32, %c0_i32_0 : i32, i32, i32
  }
  func.func @transform_8(%arg0: i32, %arg1: i32) -> (i32, i32, i32) {
    %c0_i32 = arith.constant 0 : i32
    %c0_i32_0 = arith.constant 0 : i32
    %c0_i32_1 = arith.constant 0 : i32
    return %arg1, %c0_i32, %c0_i32_0 : i32, i32, i32
  }
  func.func @transform_9(%arg0: i32, %arg1: i32) -> (i32, i32, i32) {
    %c0_i32 = arith.constant 0 : i32
    %c0_i32_0 = arith.constant 0 : i32
    %c0_i32_1 = arith.constant 0 : i32
    return %arg1, %c0_i32, %c0_i32_0 : i32, i32, i32
  }
  func.func @transform_10(%arg0: i32, %arg1: i32) -> (i32, i32, i32) {
    %c0_i32 = arith.constant 0 : i32
    %c0_i32_0 = arith.constant 0 : i32
    %c0_i32_1 = arith.constant 0 : i32
    return %arg1, %c0_i32, %c0_i32_0 : i32, i32, i32
  }
  func.func @transform_11(%arg0: i32, %arg1: i32) -> (i32, i32, i32) {
    %c0_i32 = arith.constant 0 : i32
    %c0_i32_0 = arith.constant 0 : i32
    %c0_i32_1 = arith.constant 0 : i32
    return %arg0, %c0_i32, %c0_i32_0 : i32, i32, i32
  }
}

</mosaic_0001>

<bundles_post_ra>
// kernel: forward.1
= control target key start
LH: loop header
LB: loop body
LE: loop exit
PB: predicated region body
PF: predicated region fallthrough
CT: control target
= control target key end

     0   :  { %s1506_s17 = smov 0   ;;  %s1508_s18 = smov 0   ;;  %s1799_s0 = inlined_call_operand.vmem [shape: f32[2,4,192], index: 0, kind: input, shape index: {}]   ;;  %s1800_s1 = inlined_call_operand.vmem [shape: f32[192,32], index: 1, kind: input, shape index: {}]   ;;  %s1801_s2 = inlined_call_operand.vmem [shape: f32[5,32], index: 2, kind: input, shape index: {}]   ;;  %s1802_s3 = inlined_call_operand.vmem [shape: f32[2,32], index: 3, kind: input, shape index: {}]   ;;  %s1803_s4 = inlined_call_operand.vmem [shape: f32[2,32,96], index: 4, kind: input, shape index: {}]   ;;  %s1804_s5 = inlined_call_operand.vmem [shape: f32[2,1,96], index: 5, kind: input, shape index: {}]   ;;  %s1805_s6 = inlined_call_operand.vmem [shape: f32[2,32,32], index: 6, kind: input, shape index: {}]   ;;  %s1806_s7 = inlined_call_operand.vmem [shape: f32[2,32,128], index: 7, kind: input, shape index: {}]   ;;  %s1807_s8 = inlined_call_operand.vmem [shape: f32[2,1,128], index: 8, kind: input, shape index: {}]   ;;  %s1808_s9 = inlined_call_operand.vmem [shape: f32[2,128,32], index: 9, kind: input, shape index: {}]   ;;  %s1809_s10 = inlined_call_operand.vmem [shape: f32[2,6,32], index: 10, kind: input, shape index: {}]   ;;  %s1810_s11 = inlined_call_operand.vmem [shape: f32[2,5,32], index: 11, kind: output, shape index: {}]  }
   0x1   :  { %1814 = sst [smem:[#allocation7_spill]] %s1799_s0  ;;  %s1510_s19 = smov 0  }
   0x2   :  { %1815 = sst [smem:[#allocation8_spill]] %s1803_s4  ;;  %s1512_s20 = smov 0  }
   0x3   :  { %1816 = sst [smem:[#allocation9_spill]] %s1805_s6  ;;  %s1514_s21 = smov 0  }
   0x4 LB: > { %1817 = sst [smem:[#allocation2_spill]] %s1425_s19  ;;  %s30_s22 = sadd.s32 1, %s1425_s19  ;;  %s1433_s21 = sphi %s1514_s21, %s21_s21   ;;  %s1429_s20 = sphi %s1512_s20, %s1830_s20   ;;  %s1425_s19 = sphi %s1510_s19, %s1829_s19   ;;  %s1421_s18 = sphi %s1508_s18, %s1828_s18   ;;  %s1417_s17 = sphi %s1506_s17, %s1827_s17  }
   0x5   : > { %1818 = sst [smem:[#allocation3_spill]] %s1429_s20  ;;  %s33_s23 = sadd.s32 1, %s1429_s20 }
   0x6   : > { %1819 = sst [smem:[#allocation4_spill]] %s1433_s21  ;;  %p31_p0 = scmp.ge.s32.totalorder %s30_s22, 2 }
   0x7   : > { %p1278_p1 = scmp.ge.s32.totalorder %s1433_s21, 1  ;;  %p414_p2 = scmp.lt.s32.totalorder %s1433_s21, 5 }
   0x8   : > { %s1832_s22 = smov (%p31_p0, %s30_s22), 0  ;;  %s1834_s23 = smov (!%p31_p0, %s33_s23), %s1429_s20 }
   0x9   : > { %1820 = sst [smem:[#allocation5_spill]] %s1832_s22  ;;  %p415_p3 = pnand %p1278_p1, %p414_p2 }
   0xa   : > { %p35_p4 = scmp.ge.s32.totalorder %s1834_s23, 2  ;;  %p483_p5 = scmp.lt.s32.totalorder (!%p415_p3), %s1421_s18, 1 }
   0xb   : > { %418 = sbr.rel (%p415_p3) target bundleno = 2456 (0x998), region = 64  ;;  %p488_p6 = scmp.lt.s32.totalorder (!%p415_p3), %s1417_s17, 1 }
   0xc   : > { %s1836_s23 = smov (%p35_p4, %s1834_s23), 0  ;;  %s1822_s0 = sld [smem:[#allocation7_spill]] (!%p415_p3) }
   0xd   : > { %1821 = sst [smem:[#allocation6_spill]] %s1836_s23  ;;  %p1291_p7 = scmp.ne.s32.totalorder (!%p415_p3), %s1417_s17, 0 }
   0xe   : > { %s1823_s4 = sld [smem:[#allocation8_spill]] (!%p415_p3) }
   0xf   : > { %s1824_s6 = sld [smem:[#allocation9_spill]] (!%p415_p3) }
  0x10   : > { %s1838_s18 = smov (!%p483_p5, %s1421_s18), 1 }
  0x11   : > { %s1540_s24 = scalar_select %p488_p6, %s1417_s17, 1 }
  0x12   : > { %s1307_s25 = sshll.u32 %s1838_s18, 3 }
  0x13   : > { %s1545_s28 = scalar_lea.vmem %s1822_s0, %s1307_s25  ;;  %s1308_s29 = sshll.u32 %s1540_s24, 5 }
  0x14   : > { %s1551_s13 = scalar_lea.vmem %s1823_s4, %s1308_s29  ;;  %s1565_s26 = scalar_lea.vmem %s1806_s7, %s1308_s29 }
  0x15   : > { %s1560_s20 = scalar_lea.vmem %s1824_s6, %s1308_s29  ;;  %s508_s30 = scalar_lea.vmem %s1807_s8, %s1540_s24 }
  0x16   : > { %s1311_s12 = sshll.u32 %s1540_s24, 7  ;;  %s1289_s15 = sshll.u32 %s1540_s24, 3 }
  0x17   : > { %s1575_s14 = scalar_lea.vmem %s1808_s9, %s1311_s12  ;;  %s1581_s23 = scalar_lea.vmem %s1809_s10, %s1289_s15 }
  0x18   : > { %s1586_s29 = scalar_lea.vmem %s1810_s11, %s1307_s25  ;;  %526 = sbr.rel (%p1291_p7) target bundleno = 465 (0x1d1), region = 68 }
  0x1d   : > { %v542_v0 = vld [vmem:[%s1800_s1 + $0x70] sm:$0xff]  ;;  %v543_v1 = vld [vmem:[%s1800_s1 + $0x78] sm:$0xff]  ;;  %v540_v2 = vld [vmem:[%s1800_s1 + $0x60] sm:$0xff]  ;;  %vm574_vm0 = vcmask 523264   ;;  %vm607_vm1 = vcmask 1040384   ;;  %vm610_vm2 = vcmask 258048  }
  0x1e   : > { %v569_v3 = vpack.c.bf16 %v543_v1, %v542_v0  ;;  %v541_v4 = vld [vmem:[%s1800_s1 + $0x68] sm:$0xff]  ;;  %v550_v5 = vld [vmem:[%s1800_s1 + $0xb0] sm:$0xff]  ;;  %v551_v6 = vld [vmem:[%s1800_s1 + $0xb8] sm:$0xff]  ;;  %v1435_v51 = vmov 32.0  }
  0x1f   : > { %v568_v7 = vpack.c.bf16 %v541_v4, %v540_v2  ;;  %v573_v8 = vpack.c.bf16 %v551_v6, %v550_v5  ;;  %v548_v9 = vld [vmem:[%s1800_s1 + $0xa0] sm:$0xff]  ;;  %v549_v10 = vld [vmem:[%s1800_s1 + $0xa8] sm:$0xff]  ;;  %v538_v11 = vld [vmem:[%s1800_s1 + $0x50] sm:$0xff]  ;;  %1363 = vrcp.f32 %v1435_v51 }
  0x20   : > { %578 = vmatpush.bf16.msra.mxu0 %v569_v3  ;;  %v539_v12 = vld [vmem:[%s1800_s1 + $0x58] sm:$0xff]  ;;  %v572_v13 = vpack.c.bf16 %v549_v10, %v548_v9  ;;  %v546_v14 = vld [vmem:[%s1800_s1 + $0x90] sm:$0xff]  ;;  %v527_v16 = vld [vmem:[%s1545_s28] sm:$0xff] }
  0x21   : > { %595 = vmatpush.bf16.msra.mxu1 %v573_v8  ;;  %v547_v15 = vld [vmem:[%s1800_s1 + $0x98] sm:$0xff]  ;;  %v567_v17 = vpack.c.bf16 %v539_v12, %v538_v11  ;;  %555 = vst [vmem:[#allocation1] ss:$2 sm:$0xff] %v527_v16  ;;  %v536_v18 = vld [vmem:[%s1800_s1 + $0x40] sm:$0xff]  ;;  %v537_v19 = vld [vmem:[%s1800_s1 + $0x48] sm:$0xff] }
  0x22   : > { %v571_v20 = vpack.c.bf16 %v547_v15, %v546_v14  ;;  %v544_v21 = vld [vmem:[%s1800_s1 + $0x80] sm:$0xff]  ;;  %v545_v22 = vld [vmem:[%s1800_s1 + $0x88] sm:$0xff]  ;;  %v566_v23 = vpack.c.bf16 %v537_v19, %v536_v18  ;;  %v534_v24 = vld [vmem:[%s1800_s1 + $0x30] sm:$0xff] }
  0x23   : > { %v535_v25 = vld [vmem:[%s1800_s1 + $0x38] sm:$0xff]  ;;  %v570_v26 = vpack.c.bf16 %v545_v22, %v544_v21  ;;  %v532_v29 = vld [vmem:[%s1800_s1 + $0x20] sm:$0xff]  ;;  %v533_v30 = vld [vmem:[%s1800_s1 + $0x28] sm:$0xff] }
  0x24   : > { %579 = vmatpush.bf16.msra.mxu0 %v568_v7  ;;  %v565_v28 = vpack.c.bf16 %v535_v25, %v534_v24  ;;  %v564_v32 = vpack.c.bf16 %v533_v30, %v532_v29  ;;  %v530_v33 = vld [vmem:[%s1800_s1 + $0x10] sm:$0xff]  ;;  %v531_v34 = vld [vmem:[%s1800_s1 + $0x18] sm:$0xff]  ;;  %v528_v36 = vld [vmem:[%s1800_s1] sm:$0xff] }
  0x25   : > { %596 = vmatpush.bf16.msra.mxu1 %v572_v13  ;;  %v563_v35 = vpack.c.bf16 %v531_v34, %v530_v33  ;;  %v529_v37 = vld [vmem:[%s1800_s1 + $0x8] sm:$0xff]  ;;  %v552_v46 = vld [vmem:[%s1801_s2] sm:$0x1f]  ;;  %v1364_v52 = vpop.eup %1363 }
  0x26   : > { %v562_v38 = vpack.c.bf16 %v529_v37, %v528_v36  ;;  %v615_v53 = vmul.f32 32.0, %v1364_v52  ;;  %vm619_vm3 = vweird.f32 %v1364_v52  ;;  %v553_v6 = vld [vmem:[%s1802_s3] sm:$0x3] }
  0x27   : > { %v640_v9 = vperm.slane %v553_v6, 0  ;;  %v642_v11 = vperm.slane %v553_v6, 1 }
  0x28   : > { %580 = vmatpush.bf16.msra.mxu0 %v567_v17  ;;  %v557_v27 = vld.sshfl [vmem:[#allocation1 + $0x8] sm:$0xff pattern:$0x75316420]  ;;  %v556_v39 = vld.sshfl [vmem:[#allocation1] sm:$0xff pattern:$0x75316420] }
  0x29   : > { %597 = vmatpush.bf16.msra.mxu1 %v571_v20  ;;  %v561_v31 = vpack.c.bf16 %v557_v27, %v557_v27  ;;  %v560_v40 = vpack.c.bf16 %v556_v39, %v556_v39  ;;  %v616_v54 = vsub.f32 1.0, %v615_v53 }
  0x2b   : > { %v617_v55 = vmul.f32 %v1364_v52, %v616_v54 }
  0x2c   : > { %581 = vmatpush.bf16.msra.mxu0 %v566_v23 }
  0x2d   : > { %598 = vmatpush.bf16.msra.mxu1 %v570_v26  ;;  %v618_v56 = vadd.f32 %v1364_v52, %v617_v55 }
  0x2f   : > { %v620_v57 = vsel %vm619_vm3, %v1364_v52, %v618_v56 }
  0x30   : > { %582 = vmatpush.bf16.msra.mxu0 %v565_v28  ;;  %1292 = vmatmul.msk.bf16.vlgmr.msra.gmra.mxu1 %vm574_vm0, %v561_v31 }
  0x34   : > { %583 = vmatpush.bf16.msra.mxu0 %v564_v32 }
  0x38   : > { %584 = vmatpush.bf16.msra.mxu0 %v563_v35 }
  0x3c   : > { %585 = vmatpush.bf16.msra.mxu0 %v562_v38 }
  0x3f   : > { %586 = vmatmul.bf16.vlgmr.msra.gmra.mxu0 %v560_v40 }
  0xad   : > { %v600_v41 = vpop.f32.mrf.mxu1 }
  0xb5   : > { %v602_v42 = vpop.f32.mrf.mxu1 }
  0xbc   : > { %v587_v43 = vpop.f32.mrf.mxu0 }
  0xbd   : > { %v601_v44 = vadd.f32 %v600_v41, %v587_v43 }
  0xbf   : > { %v605_v45 = vrot.slane %v601_v44, 7 }
  0xc1   : > { %v608_v47 = vsel %vm607_vm1, 0.0, %v605_v45 }
  0xc2   : > { %v609_v48 = vadd.f32 %v608_v47, %v552_v46 }
  0xc4   : > { %v589_v49 = vpop.f32.mrf.mxu0  ;;  %v611_v50 = vsel %vm610_vm2, %v609_v48, 0.0 }
  0xc5   : > { %612 = vadd.xlane.f32.xlu0 %v611_v50 }
 0x138   : > { %v613_v58 = vpop.xlane.xlu0 %612 }
 0x139   : > { %v621_v59 = vmul.f32 %v620_v57, %v613_v58 }
 0x13b   : > { %v622_v60 = vsub.f32 %v609_v48, %v621_v59 }
 0x13d   : > { %v623_v61 = vmul.f32 %v622_v60, %v622_v60 }
 0x13f   : > { %v624_v62 = vsel %vm610_vm2, %v623_v61, 0.0 }
 0x140   : > { %625 = vadd.xlane.f32.xlu0 %v624_v62 }
 0x1b3   : > { %v626_v63 = vpop.xlane.xlu0 %625 }
 0x1b4   : > { %v627_v0 = vmul.f32 %v626_v63, %v620_v57 }
 0x1b6   : > { %v628_v1 = vadd.f32 1e-05, %v627_v0 }
 0x1b8   : > { %1365 = vrsqrt.f32 %v628_v1  ;;  %vm635_vm5 = vweird.f32 %v628_v1 }
 0x1be   : > { %v1366_v2 = vpop.eup %1365 }
 0x1bf   : > { %v630_v3 = vmul.f32 %v1366_v2, %v628_v1  ;;  %vm636_vm4 = vweird.f32 %v1366_v2 }
 0x1c0   : > { %vm637_vm6 = vmor %vm635_vm5, %vm636_vm4 }
 0x1c1   : > { %v631_v4 = vmul.f32 %v1366_v2, %v630_v3 }
 0x1c3   : > { %v632_v5 = vmul.f32 0.5, %v631_v4 }
 0x1c5   : > { %v633_v7 = vsub.f32 1.5, %v632_v5 }
 0x1c7   : > { %v634_v8 = vmul.f32 %v1366_v2, %v633_v7 }
 0x1c9   : > { %v638_v10 = vsel %vm637_vm6, %v1366_v2, %v634_v8 }
 0x1ca   : > { %v639_v12 = vmul.f32 %v638_v10, %v622_v60 }
 0x1cc   : > { %v641_v13 = vmul.f32 %v640_v9, %v639_v12 }
 0x1ce   : > { %v643_v14 = vadd.f32 %v642_v11, %v641_v13 }
 0x1d0   : > { %644 = vst.msk [vmem:[%s1586_s29] sm:$0x1f] %vm610_vm2, %v643_v14 }
 0x1d1 PF: > { %vm677_vm7 = vcmask 258048   ;;  %v1436_v17 = vmov 32.0   ;;  %v648_v29 = vld [vmem:[%s1551_s13 + $0x10] sm:$0xff]  ;;  %v649_v30 = vld [vmem:[%s1551_s13 + $0x18] sm:$0xff]  ;;  %v646_v32 = vld [vmem:[%s1551_s13] sm:$0xff]  ;;  %vm717_vm12 = vcmask 261120   ;;  %s1825_s22 = scalar_lea.vmem %s1804_s5, %s1540_s24 }
 0x1d2   : > { %1369 = vrcp.f32 %v1436_v17  ;;  %v713_v31 = vpack.c.bf16 %v649_v30, %v648_v29  ;;  %v647_v33 = vld [vmem:[%s1551_s13 + $0x8] sm:$0xff]  ;;  %v1684_v43 = vld [vmem:[%s1581_s23] sm:$0x3f]  ;;  %s1437_s19 = smov 104   ;;  %s1438_s0 = smov 120   ;;  %vm768_vm13 = vcmask 64512  }
 0x1d3   : > { %v712_v34 = vpack.c.bf16 %v647_v33, %v646_v32  ;;  %v707_v45 = vperm.slane %v1684_v43, 0  ;;  %v709_v48 = vperm.slane %v1684_v43, 1  ;;  %v1367_v52 = vld [vmem:[%s1825_s22] ss:$0 sm:$0xff]  ;;  %s1439_s18 = smov 112   ;;  %s1440_s4 = smov 96  }
 0x1d4   : > { %727 = vmatpush.bf16.msra.mxu0 %v713_v31  ;;  %vm860_vm14 = vcmask 36864   ;;  %s1441_s21 = smov 64   ;;  %vm915_vm15 = vcmask 1041408   ;;  %vm916_vm0 = vcmask 1042432   ;;  %vm911_vm1 = vcmask 39936   ;;  %s1443_s27 = smov 8  }
 0x1d5   : > { %s1444_s16 = smov 24   ;;  %s1445_s28 = smov 16   ;;  %vm1011_vm2 = vcmask 130048   ;;  %vm1013_vm3 = vcmask 195584  }
 0x1d7   : > { %v645_v15 = vld [vmem:[%s1586_s29] sm:$0x1f] }
 0x1d8   : > { %v678_v16 = vsel %vm677_vm7, %v645_v15, 0.0  ;;  %v1370_v18 = vpop.eup %1369  ;;  %728 = vmatpush.bf16.msra.mxu0 %v712_v34 }
 0x1d9   : > { %679 = vadd.xlane.f32.xlu0 %v678_v16  ;;  %v682_v19 = vmul.f32 32.0, %v1370_v18  ;;  %vm686_vm8 = vweird.f32 %v1370_v18 }
 0x1db   : > { %v683_v20 = vsub.f32 1.0, %v682_v19 }
 0x1dd   : > { %v684_v21 = vmul.f32 %v1370_v18, %v683_v20 }
 0x1df   : > { %v685_v22 = vadd.f32 %v1370_v18, %v684_v21 }
 0x1e1   : > { %v1674_v23 = vsel %vm686_vm8, %v1370_v18, %v685_v22 }
 0x24c   : > { %v680_v24 = vpop.xlane.xlu0 %679 }
 0x24d   : > { %v688_v25 = vmul.f32 %v1674_v23, %v680_v24 }
 0x24f   : > { %v689_v26 = vsub.f32 %v645_v15, %v688_v25 }
 0x251   : > { %v690_v27 = vmul.f32 %v689_v26, %v689_v26 }
 0x253   : > { %v691_v28 = vsel %vm677_vm7, %v690_v27, 0.0 }
 0x254   : > { %692 = vadd.xlane.f32.xlu0 %v691_v28 }
 0x2c7   : > { %v693_v35 = vpop.xlane.xlu0 %692 }
 0x2c8   : > { %v694_v36 = vmul.f32 %v693_v35, %v1674_v23 }
 0x2ca   : > { %v695_v37 = vadd.f32 1e-05, %v694_v36 }
 0x2cc   : > { %1371 = vrsqrt.f32 %v695_v37  ;;  %vm702_vm10 = vweird.f32 %v695_v37 }
 0x2d2   : > { %v1372_v38 = vpop.eup %1371 }
 0x2d3   : > { %v697_v39 = vmul.f32 %v1372_v38, %v695_v37  ;;  %vm703_vm9 = vweird.f32 %v1372_v38 }
 0x2d4   : > { %vm704_vm11 = vmor %vm702_vm10, %vm703_vm9 }
 0x2d5   : > { %v698_v40 = vmul.f32 %v1372_v38, %v697_v39 }
 0x2d7   : > { %v699_v41 = vmul.f32 0.5, %v698_v40 }
 0x2d9   : > { %v700_v42 = vsub.f32 1.5, %v699_v41 }
 0x2db   : > { %v701_v44 = vmul.f32 %v1372_v38, %v700_v42 }
 0x2dd   : > { %v705_v46 = vsel %vm704_vm11, %v1372_v38, %v701_v44 }
 0x2de   : > { %v706_v47 = vmul.f32 %v705_v46, %v689_v26 }
 0x2e0   : > { %v708_v49 = vmul.f32 %v707_v45, %v706_v47 }
 0x2e2   : > { %v1688_v50 = vadd.f32 %v709_v48, %v708_v49 }
 0x2e4   : > { %v711_v51 = vpack.c.bf16 %v1688_v50, %v1688_v50 }
 0x2e6   : > { %1293 = vmatmul.msk.bf16.vlgmr.msra.gmra.mxu0 %vm717_vm12, %v711_v51 }
 0x363   : > { %v730_v53 = vpop.f32.mrf.mxu0 }
 0x364   : > { %v731_v54 = vadd.f32 %v1367_v52, %v730_v53  ;;  %v1442_v52 = vmov 65535  }
 0x365   : > { %v917_v53 = vsel %vm915_vm15, 4294967295, %v1442_v52 }
 0x366   : > { %756 = vrot.lane.b32.xlu2 %v731_v54, %s1437_s19  ;;  %750 = vrot.lane.b32.xlu1 %v731_v54, %s1438_s0  ;;  %v734_v56 = vmul.f32 0.35355338, %v731_v54  ;;  %v759_v61 = vpack.c.bf16 %v731_v54, %v731_v54 }
 0x368   : > { %v764_v62 = vunpack.c.l.b16 %v759_v61  ;;  %v745_v17 = vpack.c.bf16 %v734_v56, %v734_v56 }
 0x36a   : > { %v1702_v63 = vpack.c.b16 %v764_v62, %v764_v62 }
 0x36b   : > { %v732_v55 = vpop.f32.mrf.mxu0 }
 0x36c   : > { %v918_v55 = vsel %vm916_vm0, %v917_v53, 0 }
 0x36e   : > { %753 = vrot.lane.b32.xlu1 %v731_v54, %s1439_s18 }
 0x376   : > { %736 = vrot.lane.b32.xlu1 %v734_v56, %s1438_s0 }
 0x3c0   : > { %v757_v57 = vpop.permute.xlu2 %756 }
 0x3c1   : > { %v762_v58 = vpack.c.bf16 %v757_v57, %v757_v57 }
 0x3c3   : > { %v837_v59 = vunpack.c.l.b16 %v762_v58 }
 0x3c5   : > { %v1699_v60 = vpack.c.b16 %v837_v59, %v837_v59 }
 0x3c7   : > { %839 = vrot.lane.b32.xlu1 %v1699_v60, %s1440_s4 }
 0x3cf   : > { %766 = vrot.lane.b32.xlu1 %v1702_v63, %s1440_s4 }
 0x3d8   : > { %v751_v0 = vpop.permute.xlu1 %750 }
 0x3d9   : > { %v760_v1 = vpack.c.bf16 %v751_v0, %v751_v0 }
 0x3db   : > { %v789_v2 = vunpack.c.l.b16 %v760_v1 }
 0x3dd   : > { %v790_v3 = vpack.c.b16 %v789_v2, %v789_v2 }
 0x3df   : > { %791 = vrot.lane.b32.xlu2 %v790_v3, %s1440_s4 }
 0x3e0   : > { %v754_v4 = vpop.permute.xlu1 %753 }
 0x3e1   : > { %v761_v5 = vpack.c.bf16 %v754_v4, %v754_v4 }
 0x3e3   : > { %v813_v6 = vunpack.c.l.b16 %v761_v5 }
 0x3e5   : > { %v1705_v7 = vpack.c.b16 %v813_v6, %v813_v6 }
 0x3e7   : > { %815 = vrot.lane.b32.xlu0 %v1705_v7, %s1440_s4  ;;  %739 = vrot.lane.b32.xlu2 %v734_v56, %s1439_s18 }
 0x3e8   : > { %v737_v8 = vpop.permute.xlu1 %736 }
 0x3e9   : > { %v746_v13 = vpack.c.bf16 %v737_v8, %v737_v8 }
 0x3ef   : > { %742 = vrot.lane.b32.xlu2 %v734_v56, %s1437_s19 }
 0x439   : > { %v792_v9 = vpop.permute.xlu2 %791  ;;  %v840_v10 = vpop.permute.xlu1 %839 }
 0x43a   : > { %v797_v11 = vsel %vm768_vm13, %v792_v9, 0  ;;  %v845_v12 = vsel %vm768_vm13, %v840_v10, 0 }
 0x43b   : > { %806 = vmatpush.bf16.xpose.msra.mxu2 %v797_v11  ;;  %854 = vmatpush.bf16.xpose.msrb.mxu0 %v845_v12 }
 0x441   : > { %v740_v14 = vpop.permute.xlu2 %739  ;;  %v767_v15 = vpop.permute.xlu1 %766 }
 0x442   : > { %1295 = vmatmul.msk.bf16.vlgmr.msra.gmra.mxu2 %vm768_vm13, %v746_v13  ;;  %v773_v16 = vsel %vm768_vm13, %v767_v15, 0  ;;  %v747_v22 = vpack.c.bf16 %v740_v14, %v740_v14 }
 0x443   : > { %782 = vmatpush.bf16.xpose.msra.mxu1 %v773_v16 }
 0x449   : > { %v743_v18 = vpop.permute.xlu2 %742 }
 0x44a   : > { %v748_v19 = vpack.c.bf16 %v743_v18, %v743_v18  ;;  %1294 = vmatmul.msk.bf16.vlgmr.msra.gmra.mxu1 %vm768_vm13, %v745_v17 }
 0x44c   : > { %1297 = vmatmul.msk.bf16.vlgmr.msrb.gmra.mxu0 %vm768_vm13, %v748_v19 }
 0x459   : > { %v816_v20 = vpop.permute.xlu0 %815 }
 0x45a   : > { %v821_v21 = vsel %vm768_vm13, %v816_v20, 0 }
 0x45b   : > { %830 = vmatpush.bf16.xpose.msra.mxu3 %v821_v21 }
 0x462   : > { %1296 = vmatmul.msk.bf16.vlgmr.msra.gmra.mxu3 %vm768_vm13, %v747_v22 }
 0x4c5   : > { %v808_v24 = vpop.f32.mrf.mxu2 }
 0x4c6   : > { %v864_v25 = vsel %vm860_vm14, %v808_v24, -inf }
 0x4c7   : > { %865 = vmax.xlane.f32.xlu2 %v864_v25  ;;  %v784_v26 = vpop.f32.mrf.mxu1 }
 0x4c8   : > { %v861_v30 = vsel %vm860_vm14, %v784_v26, -inf }
 0x4c9   : > { %v856_v27 = vpop.f32.mrf.mxu0 }
 0x4ca   : > { %v870_v28 = vsel %vm860_vm14, %v856_v27, -inf }
 0x4cb   : > { %871 = vmax.xlane.f32.xlu1 %v870_v28 }
 0x4cd   : > { %v810_v29 = vpop.f32.mrf.mxu2 }
 0x4cf   : > { %862 = vmax.xlane.f32.xlu2 %v861_v30  ;;  %v786_v31 = vpop.f32.mrf.mxu1  ;;  %v653_v30 = vld [vmem:[%s1560_s20 + $0x10] sm:$0xff] }
 0x4d0   : > { %v654_v31 = vld [vmem:[%s1560_s20 + $0x18] sm:$0xff] }
 0x4d1   : > { %v858_v32 = vpop.f32.mrf.mxu0 }
 0x4d2   : > { %v1017_v32 = vpack.c.bf16 %v654_v31, %v653_v30  ;;  %v662_v31 = vld [vmem:[%s1575_s14 + $0x10] sm:$0xff] }
 0x4e4   : > { %935 = vrot.lane.b32.xlu1 %v790_v3, %s1441_s21 }
 0x4e5   : > { %v832_v33 = vpop.f32.mrf.mxu3 }
 0x4e6   : > { %v867_v34 = vsel %vm860_vm14, %v832_v33, -inf }
 0x4e7   : > { %868 = vmax.xlane.f32.xlu0 %v867_v34  ;;  %v652_v34 = vld [vmem:[%s1560_s20 + $0x8] sm:$0xff] }
 0x4ed   : > { %v834_v35 = vpop.f32.mrf.mxu3 }
 0x53a   : > { %v866_v36 = vpop.xlane.xlu2 %865 }
 0x53b   : > { %v874_v39 = vsub.f32 %v808_v24, %v866_v36 }
 0x53d   : > { %v879_v44 = vmul.f32 1.442695, %v874_v39 }
 0x53e   : > { %v872_v37 = vpop.xlane.xlu1 %871 }
 0x53f   : > { %v876_v38 = vsub.f32 %v856_v27, %v872_v37 }
 0x541   : > { %v883_v40 = vmul.f32 1.442695, %v876_v38 }
 0x542   : > { %v863_v41 = vpop.xlane.xlu2 %862 }
 0x543   : > { %1373 = vpow2.f32 %v883_v40  ;;  %v873_v42 = vsub.f32 %v784_v26, %v863_v41 }
 0x545   : > { %v877_v45 = vmul.f32 1.442695, %v873_v42 }
 0x547   : > { %1375 = vpow2.f32 %v877_v45 }
 0x548   : > { %1377 = vpow2.f32 %v879_v44  ;;  %v1035_v44 = vperm.slane %v1684_v43, 4 }
 0x549   : > { %v1374_v46 = vpop.eup %1373 }
 0x54a   : > { %v894_v47 = vsel %vm860_vm14, %v1374_v46, 0.0 }
 0x54b   : > { %895 = vadd.xlane.f32.xlu0 %v894_v47 }
 0x54d   : > { %v1376_v48 = vpop.eup %1375 }
 0x54e   : > { %v885_v49 = vsel %vm860_vm14, %v1376_v48, 0.0  ;;  %v1378_v51 = vpop.eup %1377 }
 0x54f   : > { %886 = vadd.xlane.f32.xlu1 %v885_v49  ;;  %v888_v54 = vsel %vm860_vm14, %v1378_v51, 0.0 }
 0x553   : > { %889 = vadd.xlane.f32.xlu0 %v888_v54 }
 0x556   : > { %v936_v56 = vpop.permute.xlu1 %935 }
 0x557   : > { %v941_v57 = vand.u32 %v936_v56, %v918_v55  ;;  %v657_v56 = vld [vmem:[%s1565_s26 + $0x10] sm:$0xff] }
 0x559   : > { %950 = vmatpush.bf16.msrb.mxu2 %v941_v57  ;;  %v658_v57 = vld [vmem:[%s1565_s26 + $0x18] sm:$0xff] }
 0x55a   : > { %v869_v58 = vpop.xlane.xlu0 %868 }
 0x55b   : > { %v875_v59 = vsub.f32 %v832_v33, %v869_v58  ;;  %v651_v33 = vld [vmem:[%s1560_s20] sm:$0xff] }
 0x55c   : > { %v1016_v35 = vpack.c.bf16 %v652_v34, %v651_v33  ;;  %v655_v58 = vld [vmem:[%s1565_s26] sm:$0xff] }
 0x55d   : > { %v881_v61 = vmul.f32 1.442695, %v875_v59  ;;  %v656_v59 = vld [vmem:[%s1565_s26 + $0x8] sm:$0xff]  ;;  %v1368_v34 = vld [vmem:[%s508_s30] ss:$0 sm:$0xff] }
 0x55f   : > { %1379 = vpow2.f32 %v881_v61  ;;  %v1064_v61 = vpack.c.bf16 %v656_v59, %v655_v58  ;;  %v1129_v59 = vperm.slane %v1684_v43, 5 }
 0x565   : > { %v1380_v62 = vpop.eup %1379 }
 0x566   : > { %v891_v0 = vsel %vm860_vm14, %v1380_v62, 0.0 }
 0x567   : > { %977 = vrot.lane.b32.xlu0 %v1699_v60, %s1441_s21  ;;  %892 = vadd.xlane.f32.xlu2 %v891_v0 }
 0x57f   : > { %956 = vrot.lane.b32.xlu2 %v1705_v7, %s1441_s21 }
 0x587   : > { %909 = vrot.lane.b32.xlu2 %v1702_v63, %s1441_s21 }
 0x5be   : > { %v896_v1 = vpop.xlane.xlu0 %895 }
 0x5c2   : > { %v887_v11 = vpop.xlane.xlu1 %886 }
 0x5c6   : > { %v890_v2 = vpop.xlane.xlu0 %889 }
 0x5c7   : > { %1381 = vrcp.f32 %v890_v2 }
 0x5c8   : > { %1383 = vrcp.f32 %v896_v1 }
 0x5cd   : > { %v1382_v3 = vpop.eup %1381 }
 0x5ce   : > { %v902_v4 = vmul.f32 %v1382_v3, %v1378_v51  ;;  %v1384_v6 = vpop.eup %1383 }
 0x5cf   : > { %v904_v8 = vmul.f32 %v1384_v6, %v1374_v46 }
 0x5d0   : > { %v906_v5 = vpack.c.bf16 %v902_v4, %v902_v4 }
 0x5d1   : > { %v908_v7 = vpack.c.bf16 %v904_v8, %v904_v8 }
 0x5d2   : > { %1299 = vmatmul.msk.bf16.vlgmr.msrb.gmra.mxu2 %vm911_vm1, %v906_v5 }
 0x5d9   : > { %v978_v60 = vpop.permute.xlu0 %977 }
 0x5da   : > { %v983_v9 = vand.u32 %v978_v60, %v918_v55  ;;  %v893_v10 = vpop.xlane.xlu2 %892  ;;  %v1059_v60 = vperm.slane %v1684_v43, 2 }
 0x5db   : > { %1385 = vrcp.f32 %v893_v10  ;;  %v1061_v10 = vperm.slane %v1684_v43, 3 }
 0x5dc   : > { %992 = vmatpush.bf16.msra.mxu0 %v983_v9  ;;  %1387 = vrcp.f32 %v887_v11 }
 0x5df   : > { %1301 = vmatmul.msk.bf16.vlgmr.msra.gmra.mxu0 %vm911_vm1, %v908_v7 }
 0x5e1   : > { %v1386_v63 = vpop.eup %1385 }
 0x5e2   : > { %v903_v12 = vmul.f32 %v1386_v63, %v1380_v62  ;;  %v957_v13 = vpop.permute.xlu2 %956  ;;  %v1388_v16 = vpop.eup %1387 }
 0x5e3   : > { %v962_v14 = vand.u32 %v957_v13, %v918_v55  ;;  %v901_v17 = vmul.f32 %v1388_v16, %v1376_v48  ;;  %v675_v13 = vld [vmem:[%s1575_s14 + $0x78] sm:$0xff]  ;;  %v673_v16 = vld [vmem:[%s1575_s14 + $0x68] sm:$0xff] }
 0x5e4   : > { %v907_v15 = vpack.c.bf16 %v903_v12, %v903_v12  ;;  %v674_v12 = vld [vmem:[%s1575_s14 + $0x70] sm:$0xff] }
 0x5e5   : > { %971 = vmatpush.bf16.msrb.mxu3 %v962_v14  ;;  %v905_v20 = vpack.c.bf16 %v901_v17, %v901_v17  ;;  %v1114_v14 = vpack.c.bf16 %v675_v13, %v674_v12 }
 0x5e8   : > { %1300 = vmatmul.msk.bf16.vlgmr.msrb.gmra.mxu3 %vm911_vm1, %v907_v15  ;;  %v672_v15 = vld [vmem:[%s1575_s14 + $0x60] sm:$0xff] }
 0x5e9   : > { %1115 = vmatpush.bf16.msra.mxu3 %v1114_v14  ;;  %v1113_v17 = vpack.c.bf16 %v673_v16, %v672_v15 }
 0x5ea   : > { %v910_v18 = vpop.permute.xlu2 %909 }
 0x5eb   : > { %v920_v19 = vand.u32 %v918_v55, %v910_v18  ;;  %v670_v18 = vld [vmem:[%s1575_s14 + $0x50] sm:$0xff] }
 0x5ed   : > { %929 = vmatpush.bf16.msrb.mxu1 %v920_v19  ;;  %1116 = vmatpush.bf16.msra.mxu3 %v1113_v17  ;;  %v671_v19 = vld [vmem:[%s1575_s14 + $0x58] sm:$0xff] }
 0x5f0   : > { %1298 = vmatmul.msk.bf16.vlgmr.msrb.gmra.mxu1 %vm911_vm1, %v905_v20  ;;  %v1112_v20 = vpack.c.bf16 %v671_v19, %v670_v18 }
 0x5f1   : > { %1027 = vmatpush.bf16.msra.mxu1 %v1017_v32  ;;  %v663_v32 = vld [vmem:[%s1575_s14 + $0x18] sm:$0xff] }
 0x5f2   : > { %1117 = vmatpush.bf16.msra.mxu3 %v1112_v20  ;;  %v1108_v33 = vpack.c.bf16 %v663_v32, %v662_v31 }
 0x5f5   : > { %1028 = vmatpush.bf16.msra.mxu1 %v1016_v35  ;;  %v660_v35 = vld [vmem:[%s1575_s14] sm:$0xff] }
 0x655   : > { %v952_v21 = vpop.f32.mrf.mxu2 }
 0x656   : > { %999 = vrot.lane.b32.xlu0 %v952_v21, %s1443_s27  ;;  %v668_v21 = vld [vmem:[%s1575_s14 + $0x40] sm:$0xff] }
 0x65c   : > { %v994_v22 = vpop.f32.mrf.mxu0 }
 0x65d   : > { %v954_v24 = vpop.f32.mrf.mxu2 }
 0x65e   : > { %1007 = vrot.lane.b32.xlu0 %v994_v22, %s1444_s16  ;;  %v669_v22 = vld [vmem:[%s1575_s14 + $0x48] sm:$0xff] }
 0x65f   : > { %v1111_v24 = vpack.c.bf16 %v669_v22, %v668_v21 }
 0x661   : > { %1118 = vmatpush.bf16.msra.mxu3 %v1111_v24 }
 0x664   : > { %v996_v25 = vpop.f32.mrf.mxu0 }
 0x665   : > { %v666_v25 = vld [vmem:[%s1575_s14 + $0x30] sm:$0xff] }
 0x66b   : > { %v973_v26 = vpop.f32.mrf.mxu3 }
 0x66c   : > { %1003 = vrot.lane.b32.xlu2 %v973_v26, %s1445_s28  ;;  %v667_v26 = vld [vmem:[%s1575_s14 + $0x38] sm:$0xff] }
 0x66d   : > { %v931_v27 = vpop.f32.mrf.mxu1 }
 0x673   : > { %v975_v28 = vpop.f32.mrf.mxu3 }
 0x674   : > { %v664_v28 = vld [vmem:[%s1575_s14 + $0x20] sm:$0xff] }
 0x675   : > { %v933_v29 = vpop.f32.mrf.mxu1 }
 0x676   : > { %v665_v29 = vld [vmem:[%s1575_s14 + $0x28] sm:$0xff] }
 0x677   : > { %v1109_v30 = vpack.c.bf16 %v665_v29, %v664_v28 }
 0x6c6   : > { %v1004_v38 = vpop.permute.xlu2 %1003 }
 0x6c8   : > { %v1000_v36 = vpop.permute.xlu0 %999 }
 0x6c9   : > { %v1010_v37 = vsel %vm768_vm13, %v931_v27, %v1000_v36  ;;  %v1110_v27 = vpack.c.bf16 %v667_v26, %v666_v25  ;;  %v661_v36 = vld [vmem:[%s1575_s14 + $0x8] sm:$0xff] }
 0x6ca   : > { %v1012_v40 = vsel %vm1011_vm2, %v1010_v37, %v1004_v38  ;;  %v1107_v38 = vpack.c.bf16 %v661_v36, %v660_v35 }
 0x6cb   : > { %1119 = vmatpush.bf16.msra.mxu3 %v1110_v27 }
 0x6cf   : > { %1120 = vmatpush.bf16.msra.mxu3 %v1109_v30 }
 0x6d0   : > { %v1008_v39 = vpop.permute.xlu0 %1007 }
 0x6d1   : > { %v1014_v41 = vsel %vm1013_vm3, %v1012_v40, %v1008_v39 }
 0x6d2   : > { %v1015_v42 = vpack.c.bf16 %v1014_v41, %v1014_v41 }
 0x6d3   : > { %1121 = vmatpush.bf16.msra.mxu3 %v1108_v33 }
 0x6d4   : > { %1302 = vmatmul.msk.bf16.vlgmr.msra.gmra.mxu1 %vm717_vm12, %v1015_v42 }
 0x6d7   : > { %1122 = vmatpush.bf16.msra.mxu3 %v1107_v38 }
 0x751   : > { %v1030_v45 = vpop.f32.mrf.mxu1 }
 0x752   : > { %v1034_v46 = vadd.f32 %v1030_v45, %v1688_v50  ;;  %v1065_v50 = vpack.c.bf16 %v658_v57, %v657_v56 }
 0x754   : > { %v1744_v47 = vadd.f32 %v1035_v44, %v1034_v46  ;;  %1078 = vmatpush.bf16.msra.mxu2 %v1065_v50 }
 0x756   : > { %v1037_v48 = vsel %vm677_vm7, %v1744_v47, 0.0 }
 0x757   : > { %1038 = vadd.xlane.f32.xlu2 %v1037_v48 }
 0x758   : > { %1079 = vmatpush.bf16.msra.mxu2 %v1064_v61 }
 0x759   : > { %v1032_v49 = vpop.f32.mrf.mxu1 }
 0x7ca   : > { %v1039_v51 = vpop.xlane.xlu2 %1038 }
 0x7cb   : > { %v1040_v52 = vmul.f32 %v1039_v51, %v1674_v23 }
 0x7cd   : > { %v1041_v53 = vsub.f32 %v1744_v47, %v1040_v52 }
 0x7cf   : > { %v1042_v54 = vmul.f32 %v1041_v53, %v1041_v53 }
 0x7d1   : > { %v1043_v55 = vsel %vm677_vm7, %v1042_v54, 0.0 }
 0x7d2   : > { %1044 = vadd.xlane.f32.xlu0 %v1043_v55 }
 0x845   : > { %v1045_v62 = vpop.xlane.xlu0 %1044 }
 0x846   : > { %v1046_v0 = vmul.f32 %v1045_v62, %v1674_v23 }
 0x848   : > { %v1047_v1 = vadd.f32 1e-05, %v1046_v0 }
 0x84a   : > { %1389 = vrsqrt.f32 %v1047_v1  ;;  %vm1054_vm5 = vweird.f32 %v1047_v1 }
 0x850   : > { %v1390_v2 = vpop.eup %1389 }
 0x851   : > { %v1049_v3 = vmul.f32 %v1390_v2, %v1047_v1  ;;  %vm1055_vm4 = vweird.f32 %v1390_v2 }
 0x852   : > { %vm1056_vm6 = vmor %vm1054_vm5, %vm1055_vm4 }
 0x853   : > { %v1050_v4 = vmul.f32 %v1390_v2, %v1049_v3 }
 0x855   : > { %v1051_v5 = vmul.f32 0.5, %v1050_v4 }
 0x857   : > { %v1052_v6 = vsub.f32 1.5, %v1051_v5 }
 0x859   : > { %v1053_v8 = vmul.f32 %v1390_v2, %v1052_v6 }
 0x85b   : > { %v1057_v9 = vsel %vm1056_vm6, %v1390_v2, %v1053_v8 }
 0x85c   : > { %v1058_v23 = vmul.f32 %v1057_v9, %v1041_v53 }
 0x85e   : > { %v1060_v7 = vmul.f32 %v1059_v60, %v1058_v23 }
 0x860   : > { %v1062_v11 = vadd.f32 %v1061_v10, %v1060_v7 }
 0x862   : > { %v1063_v63 = vpack.c.bf16 %v1062_v11, %v1062_v11 }
 0x864   : > { %1303 = vmatmul.msk.bf16.vlgmr.msra.gmra.mxu2 %vm717_vm12, %v1063_v63 }
 0x8e7   : > { %v1081_v37 = vpop.f32.mrf.mxu2 }
 0x8e8   : > { %v1082_v39 = vadd.f32 %v1368_v34, %v1081_v37 }
 0x8ea   : > { %v1304_v40 = vmul.f32 -1.702, %v1082_v39 }
 0x8ec   : > { %v1087_v41 = vmul.f32 1.442695, %v1304_v40 }
 0x8ee   : > { %1391 = vpow2.f32 %v1087_v41 }
 0x8ef   : > { %v1083_v42 = vpop.f32.mrf.mxu2 }
 0x8f4   : > { %v1392_v44 = vpop.eup %1391 }
 0x8f5   : > { %v1089_v45 = vadd.f32 1.0, %v1392_v44 }
 0x8f7   : > { %1393 = vrcp.f32 %v1089_v45  ;;  %v1101_v51 = vand.u32 2147483648, %v1089_v45  ;;  %v1099_v53 = vand.u32 2147483647, %v1089_v45  ;;  %vm1095_vm9 = vweird.f32 %v1089_v45 }
 0x8f9   : > { %v1102_v55 = vor.u32 1.1754944e-38, %v1101_v51  ;;  %vm1100_vm11 = vcmp.eq.f32.partialorder %v1099_v53, 8.507059e+37 }
 0x8fd   : > { %v1394_v46 = vpop.eup %1393 }
 0x8fe   : > { %v1091_v48 = vmul.f32 %v1394_v46, %v1089_v45  ;;  %vm1096_vm8 = vweird.f32 %v1394_v46 }
 0x8ff   : > { %vm1097_vm10 = vmor %vm1095_vm9, %vm1096_vm8 }
 0x900   : > { %v1092_v49 = vsub.f32 1.0, %v1091_v48 }
 0x902   : > { %v1093_v52 = vmul.f32 %v1394_v46, %v1092_v49 }
 0x904   : > { %v1094_v54 = vadd.f32 %v1394_v46, %v1093_v52 }
 0x906   : > { %v1098_v56 = vsel %vm1097_vm10, %v1394_v46, %v1094_v54 }
 0x907   : > { %v1103_v57 = vsel %vm1100_vm11, %v1102_v55, %v1098_v56 }
 0x908   : > { %v1105_v50 = vmul.f32 %v1103_v57, %v1082_v39 }
 0x90a   : > { %v1106_v58 = vpack.c.bf16 %v1105_v50, %v1105_v50 }
 0x90c   : > { %1123 = vmatmul.bf16.vlgmr.msra.gmra.mxu3 %v1106_v58 }
 0x98f   : > { %v1124_v61 = vpop.f32.mrf.mxu3 }
 0x990   : > { %v1128_v62 = vadd.f32 %v1124_v61, %v1744_v47 }
 0x992   : > { %v1130_v0 = vadd.f32 %v1129_v59, %v1128_v62 }
 0x994   : > { %1131 = vst.msk [vmem:[%s1586_s29] sm:$0x1f] %vm677_vm7, %v1130_v0 }
 0x997   : > { %v1126_v1 = vpop.f32.mrf.mxu3 }
 0x998 PF: > { %s1826_s24 = sld [smem:[#allocation4_spill]] }
 0x999   : > { %s1827_s17 = sld [smem:[#allocation2_spill]] }
 0x99a   : > { %s1828_s18 = sld [smem:[#allocation3_spill]] }
 0x99b   : > { %s1829_s19 = sld [smem:[#allocation5_spill]] }
 0x99c   : > { %s1830_s20 = sld [smem:[#allocation6_spill]] }
 0x99e   : > { %s21_s21 = sadd.s32 1, %s1826_s24  }
 0x99f   : > { %p18_p8 = scmp.ge.s32.totalorder %s21_s21, 6  }
 0x9a1   :  { %20 = sbr.rel (!%p18_p8) target bundleno = 4 (0x4), region = 119 }

</bundles_post_ra>
